<compile_context>
chip_gen: v7x
topology: tpu7x:2x2x1
jax: 0.10.0
libtpu: 0.0.40
codegen_flags: <defaults>
</compile_context>

<pallas_src>
import functools

import jax
import jax.numpy as jnp
from jax.experimental import pallas as pl
from jax.experimental.pallas import tpu as pltpu


# ------------------------------------------------------------------------------------------
# Per-generation VMEM budgeting.
# ------------------------------------------------------------------------------------------

@functools.lru_cache(maxsize=None)
def _vmem_budget():
    """Returns (double-buffered weight-tile byte cap, vmem_limit_bytes)."""
    try:
        cap = int(pltpu.get_tpu_info().vmem_capacity_bytes)
    except Exception:
        cap = 64 * 1024 * 1024
    if cap >= 96 * 1024 * 1024:           # v5e / v6e: 128 MiB physical VMEM
        return 12 << 20, 64 << 20
    return 6 << 20, 40 << 20              # v7x: 64 MiB physical -> keep tiles conservative


def _has_buffered():
    try:
        pl.BlockSpec((8, 128), lambda i: (0, 0), pipeline_mode=pl.Buffered(3))
        return True
    except Exception:
        return False


_HAS_BUFFERED = _has_buffered()


def _round_up(x, m):
    return (x + m - 1) // m * m


def _choose_tm(M):
    if M % 256 == 0 and M >= 256:
        return 256
    if M % 128 == 0 and M >= 128:
        return 128
    if M >= 256:
        return 256
    if M >= 128:
        return 128
    return _round_up(max(M, 1), 8)


def _choose_tn(N, K):
    if N % 128 != 0:
        return N   # N=64 layers (stem/stage-1): accept the masked store, these layers are small
    cap, _ = _vmem_budget()
    for tn in (512, 256, 128):
        if N % tn == 0 and 2 * 2 * K * tn <= cap:
            return tn
    return 128


# ------------------------------------------------------------------------------------------
# Pallas kernels
# ------------------------------------------------------------------------------------------

def _mm_bias_kernel(a_ref, b_ref, bias_ref, o_ref, *, relu):
    """out = [relu](A @ B + bias); BN scale already folded into B's columns."""
    y = jnp.dot(a_ref[...], b_ref[...], preferred_element_type=jnp.float32) + bias_ref[...]
    if relu:
        y = jnp.maximum(y, 0.0)
    o_ref[...] = y.astype(o_ref.dtype)


def _mm_bias_res_relu_kernel(a_ref, b_ref, bias_ref, res_ref, o_ref):
    """out = relu(A @ B + bias + residual) -- fused bottleneck conv3 + residual add + ReLU."""
    y = jnp.dot(a_ref[...], b_ref[...], preferred_element_type=jnp.float32)
    y = y + bias_ref[...] + res_ref[...].astype(jnp.float32)
    o_ref[...] = jnp.maximum(y, 0.0).astype(o_ref.dtype)


def _conv_tap_kernel(*refs, taps, nplanes, rows):
    """3x3 conv as 9 accumulated 1x1 matmuls over row-offset slices of flattened planes."""
    w_ref = refs[nplanes]          # (9, C, Cout) bf16
    b_ref = refs[nplanes + 1]      # (1, Cout)    f32
    o_ref = refs[nplanes + 2]      # (1, rows, Cout)
    acc = None
    for t, (pidx, off) in enumerate(taps):
        lhs = refs[pidx][0, off:off + rows, :]               # contiguous slice, no reshape
        y = jnp.dot(lhs, w_ref[t], preferred_element_type=jnp.float32)
        acc = y if acc is None else acc + y
    acc = acc + b_ref[...]
    o_ref[0] = jnp.maximum(acc, 0.0).astype(o_ref.dtype)


def _maxpool_kernel(p00_ref, p01_ref, p10_ref, p11_ref, o_ref, *, Ho, Wo):
    """3x3/stride-2 max pool from four parity planes; 9-way max computed in-kernel."""
    planes = ((p00_ref, p01_ref), (p10_ref, p11_ref))
    combos = ((0, 0), (1, 0), (0, 1))          # window offset d -> (parity, plane shift)
    m = None
    for pi, si in combos:
        for pj, sj in combos:
            w = planes[pi][pj][0, si:si + Ho, sj:sj + Wo, :]
            m = w if m is None else jnp.maximum(m, w)
    o_ref[0] = m


def _head_kernel(x_ref, w1_ref, b1_ref, w2_ref, b2_ref, o_ref):
    """Fused: global avg pool -> fc1 (collapsed) -> fc2 (padded to 128 lanes) -> sigmoid."""
    feat = jnp.mean(x_ref[...].astype(jnp.float32), axis=1)             # (B, 2048)
    h = jnp.dot(feat.astype(jnp.bfloat16), w1_ref[...],
                preferred_element_type=jnp.float32) + b1_ref[...]
    y = jnp.dot(h.astype(jnp.bfloat16), w2_ref[...],
                preferred_element_type=jnp.float32) + b2_ref[...]
    o_ref[...] = jax.nn.sigmoid(y)


# ------------------------------------------------------------------------------------------
# Wrappers around pallas_call
# ------------------------------------------------------------------------------------------

def matmul_bias(a, b, bias, relu=False, residual=None, out_dtype=jnp.bfloat16):
    """[relu](a @ b + bias [+ residual]); single full-K block, tiled over (M, N)."""
    M, K = a.shape
    K2, N = b.shape
    assert K == K2
    tm = _choose_tm(M)
    tn = _choose_tn(N, K)
    Mp = _round_up(M, tm)

    a = a.astype(jnp.bfloat16)
    if Mp != M:
        a = jnp.pad(a, ((0, Mp - M), (0, 0)))
    bias2d = bias.reshape(1, N).astype(jnp.float32)

    cap, vmem_limit = _vmem_budget()
    w_kwargs = {}
    if (_HAS_BUFFERED and Mp // tm <= 2 and N // tn >= 3
            and 2 * 3 * K * tn <= cap):
        # Small-M late-stage layers are weight-DMA bound; deeper buffering hides the stream.
        w_kwargs["pipeline_mode"] = pl.Buffered(3)

    in_specs = [
        pl.BlockSpec((tm, K), lambda i, j: (i, 0)),
        pl.BlockSpec((K, tn), lambda i, j: (0, j), **w_kwargs),
        pl.BlockSpec((1, tn), lambda i, j: (0, j)),
    ]
    args = [a, b, bias2d]
    if residual is not None:
        r = residual.astype(jnp.bfloat16)
        if Mp != M:
            r = jnp.pad(r, ((0, Mp - M), (0, 0)))
        in_specs.append(pl.BlockSpec((tm, tn), lambda i, j: (i, j)))
        args.append(r)
        kernel = _mm_bias_res_relu_kernel
    else:
        kernel = functools.partial(_mm_bias_kernel, relu=relu)

    out = pl.pallas_call(
        kernel,
        out_shape=jax.ShapeDtypeStruct((Mp, N), out_dtype),
        grid_spec=pltpu.PrefetchScalarGridSpec(
            num_scalar_prefetch=0,
            grid=(Mp // tm, N // tn),
            in_specs=in_specs,
            out_specs=pl.BlockSpec((tm, tn), lambda i, j: (i, j)),
        ),
        compiler_params=pltpu.CompilerParams(
            dimension_semantics=("parallel", "parallel"),
            vmem_limit_bytes=vmem_limit),
    )(*args)
    return out if Mp == M else out[:M]


def conv1x1_bn(x, p, stride=1, relu=True, residual=None):
    """1x1 conv (+ folded BN) as a matmul over flattened pixels; optional fused residual+ReLU."""
    B, H, W, C = x.shape
    if stride != 1:
        # TODO(synk): fold the stride-2 subsampling into the matmul A BlockSpec/index_map
        # instead of materializing this strided slice in HBM (modest bandwidth win).
        x = x[:, ::stride, ::stride, :]
        H, W = x.shape[1], x.shape[2]
    a = x.reshape(B * H * W, C)
    res2d = None if residual is None else residual.reshape(B * H * W, -1)
    out = matmul_bias(a, p["w"], p["bias"], relu=relu, residual=res2d)
    return out.reshape(B, H, W, -1)


def conv3x3_bn(x, p, stride):
    """3x3/pad-1 conv + folded BN + ReLU without materializing im2col patches in HBM.

    The padded activation is flattened (free XLA reshape) to (rows, C); each of the 9 taps is
    a contiguous row-offset slice of that plane, accumulated in-kernel into f32.  Stride-2
    convs use 4 parity planes (total size == input) so taps remain unit-stride row slices.
    Wrap-around rows (pitch - Wo per image row) are computed and sliced away afterwards.
    """
    B, H, W, C = x.shape
    Cout = p["w"].shape[-1]
    Ho = (H - 1) // stride + 1
    Wo = (W - 1) // stride + 1
    xpad = jnp.pad(x, ((0, 0), (1, 1), (1, 1), (0, 0)))

    if stride == 1:
        pitch = W + 2
        planes = [xpad.reshape(B, (H + 2) * (W + 2), C)]
        taps = tuple((0, di * pitch + dj) for di in range(3) for dj in range(3))
    else:
        Hp, Wp = H + 2, W + 2
        if Hp % 2:
            xpad = jnp.pad(xpad, ((0, 0), (0, 1), (0, 0), (0, 0)))
            Hp += 1
        if Wp % 2:
            xpad = jnp.pad(xpad, ((0, 0), (0, 0), (0, 1), (0, 0)))
            Wp += 1
        ph, pw = Hp // 2, Wp // 2
        pitch = pw
        planes = [xpad[:, pi::2, pj::2, :].reshape(B, ph * pw, C)
                  for pi in (0, 1) for pj in (0, 1)]
        taps = tuple(((di % 2) * 2 + (dj % 2), (di // 2) * pitch + (dj // 2))
                     for di in range(3) for dj in range(3))

    rows = (Ho - 1) * pitch + Wo          # output rows computed (some wrap-around garbage)
    nplanes = len(planes)
    L = planes[0].shape[1]
    w3 = p["w"].reshape(9, C, Cout)
    bias2d = p["bias"].reshape(1, Cout)

    _, vmem_limit = _vmem_budget()
    out = pl.pallas_call(
        functools.partial(_conv_tap_kernel, taps=taps, nplanes=nplanes, rows=rows),
        out_shape=jax.ShapeDtypeStruct((B, rows, Cout), jnp.bfloat16),
        grid_spec=pltpu.PrefetchScalarGridSpec(
            num_scalar_prefetch=0,
            grid=(B,),
            in_specs=[pl.BlockSpec((1, L, C), lambda b: (b, 0, 0))] * nplanes + [
                pl.BlockSpec((9, C, Cout), lambda b: (0, 0, 0)),
                pl.BlockSpec((1, Cout), lambda b: (0, 0)),
            ],
            out_specs=pl.BlockSpec((1, rows, Cout), lambda b: (b, 0, 0)),
        ),
        compiler_params=pltpu.CompilerParams(
            dimension_semantics=("parallel",),
            vmem_limit_bytes=vmem_limit),
    )(*planes, w3, bias2d)

    # Drop the wrap-around columns: valid output (i, j) lives at flat row i*pitch + j (j < Wo).
    out = jnp.pad(out, ((0, 0), (0, Ho * pitch - rows), (0, 0)))
    out = out.reshape(B, Ho, pitch, Cout)[:, :, :Wo, :]
    return out


def maxpool3x3_s2_p1(x):
    B, H, W, C = x.shape
    Ho = (H - 1) // 2 + 1
    Wo = (W - 1) // 2 + 1
    xp = jnp.pad(x, ((0, 0), (1, 1), (1, 1), (0, 0)), constant_values=-jnp.inf)
    # Four parity planes (total size == padded input) so the 9-way max only needs unit-stride
    # in-kernel slices; previously 9 shifted window copies were written to / read from HBM.
    planes = [xp[:, pi::2, pj::2, :] for pi in (0, 1) for pj in (0, 1)]
    in_specs = [pl.BlockSpec((1,) + pln.shape[1:], lambda b: (b, 0, 0, 0)) for pln in planes]
    # TODO(synk): on v7x also grid over row/channel tiles so B<=2 grids keep both TCs busy.
    return pl.pallas_call(
        functools.partial(_maxpool_kernel, Ho=Ho, Wo=Wo),
        out_shape=jax.ShapeDtypeStruct((B, Ho, Wo, C), x.dtype),
        grid_spec=pltpu.PrefetchScalarGridSpec(
            num_scalar_prefetch=0,
            grid=(B,),
            in_specs=in_specs,
            out_specs=pl.BlockSpec((1, Ho, Wo, C), lambda b: (b, 0, 0, 0)),
        ),
        compiler_params=pltpu.CompilerParams(dimension_semantics=("parallel",)),
    )(*planes)


def conv7x7_stem(x, p):
    """7x7/stride-2/pad-3 stem conv via im2col (K=147 keeps the MXU fed; C_in is only 3).

    TODO(synk): fold the 49-tap window gather into the matmul BlockSpec/index_map so the
    expanded patches are never materialized in HBM (~3.4 MB/image at 224x224).
    """
    B, H, W, C = x.shape
    pad, k, stride = 3, 7, 2
    xp = jnp.pad(x, ((0, 0), (pad, pad), (pad, pad), (0, 0)))
    Ho = (H + 2 * pad - k) // stride + 1
    Wo = (W + 2 * pad - k) // stride + 1
    cols = [xp[:, i:i + stride * (Ho - 1) + 1:stride,
               j:j + stride * (Wo - 1) + 1:stride, :]
            for i in range(k) for j in range(k)]
    patches = jnp.concatenate(cols, axis=-1).reshape(B * Ho * Wo, k * k * C)
    out = matmul_bias(patches, p["w"], p["bias"], relu=True)
    return out.reshape(B, Ho, Wo, -1)


def head_forward(x, params):
    """resnet avgpool(1x1) + adaptive_pool(14,14)==replication + fc1(collapsed) + fc2 + sigmoid."""
    B, H, W, C = x.shape
    S = H * W
    x2 = x.reshape(B, S, C)
    w1, b1 = params["fc1_w"], params["fc1_b"]
    w2, b2 = params["fc2_w"], params["fc2_b"]
    NP = w2.shape[1]                                  # fc2 padded to 128 lanes
    _, vmem_limit = _vmem_budget()
    out = pl.pallas_call(
        _head_kernel,
        out_shape=jax.ShapeDtypeStruct((B, NP), jnp.float32),
        grid_spec=pltpu.PrefetchScalarGridSpec(
            num_scalar_prefetch=0,
            grid=(1,),
            in_specs=[
                pl.BlockSpec((B, S, C), lambda i: (0, 0, 0)),
                pl.BlockSpec(w1.shape, lambda i: (0, 0)),
                pl.BlockSpec(b1.shape, lambda i: (0, 0)),
                pl.BlockSpec(w2.shape, lambda i: (0, 0)),
                pl.BlockSpec(b2.shape, lambda i: (0, 0)),
            ],
            out_specs=pl.BlockSpec((B, NP), lambda i: (0, 0)),
        ),
        compiler_params=pltpu.CompilerParams(
            dimension_semantics=("arbitrary",),
            vmem_limit_bytes=vmem_limit),
    )(x2, w1, b1, w2, b2)
    return out[:, :14]


# ------------------------------------------------------------------------------------------
# Parameters (deterministic, synthetic; BN folded into weights, weights in bf16)
# ------------------------------------------------------------------------------------------

def make_resnet50_params(key):
    counter = [0]

    def nk():
        counter[0] += 1
        return jax.random.fold_in(key, counter[0])

    def conv_bn(kh, kw, cin, cout):
        fan_in = kh * kw * cin
        w = jax.random.normal(nk(), (kh, kw, cin, cout), jnp.float32) * (2.0 / fan_in) ** 0.5
        gamma = 1.0 + 0.1 * jax.random.normal(nk(), (cout,), jnp.float32)
        beta = 0.1 * jax.random.normal(nk(), (cout,), jnp.float32)
        mean = 0.1 * jax.random.normal(nk(), (cout,), jnp.float32)
        var = 1.0 + 0.1 * jax.random.uniform(nk(), (cout,), jnp.float32)
        scale = gamma / jnp.sqrt(var + 1e-5)            # inference-mode BN folded into conv
        bias = beta - mean * scale
        w_folded = (w.reshape(kh * kw * cin, cout) * scale[None, :]).astype(jnp.bfloat16)
        return {"w": w_folded, "bias": bias.astype(jnp.float32)}

    params = {"stem": conv_bn(7, 7, 3, 64)}
    layers = []
    in_c = 64
    for (n_blocks, width), stride in zip([(3, 64), (4, 128), (6, 256), (3, 512)],
                                         [1, 2, 2, 2]):
        layer = []
        for b in range(n_blocks):
            s = stride if b == 0 else 1
            blk = {
                "stride": s,
                "conv1": conv_bn(1, 1, in_c, width),
                "conv2": conv_bn(3, 3, width, width),
                "conv3": conv_bn(1, 1, width, width * 4),
            }
            if s != 1 or in_c != width * 4:
                blk["down"] = conv_bn(1, 1, in_c, width * 4)
            layer.append(blk)
            in_c = width * 4
        layers.append(layer)
    params["layers"] = layers

    # fc1 collapse: resnet.children()[:-1] keeps ResNet's own AdaptiveAvgPool2d((1,1)), so the
    # AdaptiveAvgPool2d((14,14)) sees a 1x1 map and replicates it 14*14 times; fc1 on the
    # replicated vector reduces exactly to feat(B,2048) @ W_eff(2048,1024) with
    #   W_eff = fc1_w.reshape(2048, 196, 1024).sum(axis=1)   (NCHW flatten: idx = c*196 + p).
    # With synthetic params we generate W_eff directly instead of the 401408x1024 (1.6 GB)
    # matrix.  When importing real PyTorch weights, apply the reduction at load time.
    params["fc1_w"] = (jax.random.normal(nk(), (2048, 1024), jnp.float32)
                       * (1.0 / 2048.0) ** 0.5).astype(jnp.bfloat16)
    params["fc1_b"] = 0.01 * jax.random.normal(nk(), (1, 1024), jnp.float32)
    # fc2 (1024 -> 14): padded to 128 output lanes for an unmasked store; sliced after.
    fc2_w = jax.random.normal(nk(), (1024, 14), jnp.float32) * (1.0 / 1024.0) ** 0.5
    fc2_b = 0.01 * jax.random.normal(nk(), (14,), jnp.float32)
    params["fc2_w"] = jnp.pad(fc2_w, ((0, 0), (0, 128 - 14))).astype(jnp.bfloat16)
    params["fc2_b"] = jnp.pad(fc2_b, (0, 128 - 14)).reshape(1, 128).astype(jnp.float32)
    return params


# ------------------------------------------------------------------------------------------
# Forward pass (== ResNet50NN.forward)
# ------------------------------------------------------------------------------------------

def bottleneck(x, blk):
    s = blk["stride"]
    out = conv1x1_bn(x, blk["conv1"], stride=1, relu=True)
    out = conv3x3_bn(out, blk["conv2"], stride=s)
    identity = conv1x1_bn(x, blk["down"], stride=s, relu=False) if "down" in blk else x
    # conv3 + BN + residual add + ReLU fused into one matmul epilogue.
    return conv1x1_bn(out, blk["conv3"], stride=1, relu=True, residual=identity)


def resnet50nn_forward(images_nchw, params, encoded_image_size=14):
    # images: (B, 3, H, W) NCHW like PyTorch; transpose once to NHWC (channels on lanes), bf16.
    x = jnp.transpose(images_nchw, (0, 2, 3, 1)).astype(jnp.bfloat16)

    x = conv7x7_stem(x, params["stem"])        # conv7x7/2 + BN + ReLU
    x = maxpool3x3_s2_p1(x)                    # maxpool 3x3 / 2

    for layer in params["layers"]:
        for blk in layer:
            x = bottleneck(x, blk)

    return head_forward(x, params)             # avgpool + fc1 + fc2 + sigmoid (fused)


# ------------------------------------------------------------------------------------------

if __name__ == "__main__":
    key = jax.random.PRNGKey(0)
    params = make_resnet50_params(key)

    # Small-but-valid input: batch=2, 3 channels, 32x32 spatial (smallest that survives /32).
    images = jax.random.normal(jax.random.fold_in(key, 9999), (2, 3, 32, 32), jnp.float32)

    out = resnet50nn_forward(images, params)
    out = jax.block_until_ready(out)

    assert out.shape == (2, 14), out.shape
    assert bool(jnp.all(jnp.isfinite(out)))
    assert bool(jnp.all((out >= 0.0) & (out <= 1.0)))  # sigmoid output
    print("KERNEL_OK")
</pallas_src>

<mosaic_0001>
module attributes {stable_mosaic.version = 11 : i64} {
  func.func @_mm_bias_kernel(%arg0: i32, %arg1: i32, %arg2: memref<256x147xbf16, #tpu.memory_space<vmem>>, %arg3: memref<147x64xbf16, #tpu.memory_space<vmem>>, %arg4: memref<1x64xf32, #tpu.memory_space<vmem>>, %arg5: memref<256x64xbf16, #tpu.memory_space<vmem>>) attributes {dimension_semantics = [#tpu.dimension_semantics<parallel>, #tpu.dimension_semantics<parallel>], iteration_bounds = array<i64: 2, 1>, scalar_prefetch = 0 : i64, scratch_operands = 0 : i64, tpu.core_type = #tpu.core_type<tc>, window_params = [{transform_indices = @transform_0, window_bounds = array<i64: 256, 147>}, {transform_indices = @transform_1, window_bounds = array<i64: 147, 64>}, {transform_indices = @transform_2, window_bounds = array<i64: 1, 64>}, {transform_indices = @transform_3, window_bounds = array<i64: 256, 64>}]} {
    %c0 = arith.constant 0 : index
    %c0_0 = arith.constant 0 : index
    %0 = vector.load %arg2[%c0, %c0_0] : memref<256x147xbf16, #tpu.memory_space<vmem>>, vector<256x147xbf16>
    %c0_1 = arith.constant 0 : index
    %c0_2 = arith.constant 0 : index
    %1 = vector.load %arg3[%c0_1, %c0_2] : memref<147x64xbf16, #tpu.memory_space<vmem>>, vector<147x64xbf16>
    %cst = arith.constant dense<0.000000e+00> : vector<256x64xf32>
    %2 = tpu.matmul %0, %1, %cst {dimension_numbers = #tpu.dot_dimension_numbers<[1], [0], [0], [1], [0, 0, 1, 1], [], []>} : vector<256x147xbf16>, vector<147x64xbf16>, vector<256x64xf32> -> vector<256x64xf32>
    %c0_3 = arith.constant 0 : index
    %c0_4 = arith.constant 0 : index
    %3 = vector.load %arg4[%c0_3, %c0_4] : memref<1x64xf32, #tpu.memory_space<vmem>>, vector<1x64xf32>
    %4 = vector.broadcast %3 : vector<1x64xf32> to vector<256x64xf32>
    %5 = arith.addf %2, %4 : vector<256x64xf32>
    %cst_5 = arith.constant 0.000000e+00 : f32
    %6 = vector.broadcast %cst_5 : f32 to vector<256x64xf32>
    %7 = arith.maximumf %5, %6 : vector<256x64xf32>
    %8 = arith.truncf %7 : vector<256x64xf32> to vector<256x64xbf16>
    %c0_6 = arith.constant 0 : index
    %c0_7 = arith.constant 0 : index
    %9 = vector.load %arg5[%c0_6, %c0_7] : memref<256x64xbf16, #tpu.memory_space<vmem>>, vector<256x64xbf16>
    tpu.vector_store %arg5[%c0_6, %c0_7], %8 {strides = array<i32>} : memref<256x64xbf16, #tpu.memory_space<vmem>>, vector<256x64xbf16>,
    return
  }
  func.func @transform_0(%arg0: i32, %arg1: i32) -> (i32, i32) {
    %c0_i32 = arith.constant 0 : i32
    %c0_i32_0 = arith.constant 0 : i32
    return %arg0, %c0_i32 : i32, i32
  }
  func.func @transform_1(%arg0: i32, %arg1: i32) -> (i32, i32) {
    %c0_i32 = arith.constant 0 : i32
    %c0_i32_0 = arith.constant 0 : i32
    return %c0_i32, %arg1 : i32, i32
  }
  func.func @transform_2(%arg0: i32, %arg1: i32) -> (i32, i32) {
    %c0_i32 = arith.constant 0 : i32
    %c0_i32_0 = arith.constant 0 : i32
    return %c0_i32, %arg1 : i32, i32
  }
  func.func @transform_3(%arg0: i32, %arg1: i32) -> (i32, i32) {
    %c0_i32 = arith.constant 0 : i32
    return %arg0, %arg1 : i32, i32
  }
}

</mosaic_0001>

<bundles_post_ra>
// kernel: tpu_custom_call.1
= control target key start
LH: loop header
LB: loop body
LE: loop exit
PB: predicated region body
PF: predicated region fallthrough
CT: control target
= control target key end

     0   :  { %s1288_s12 = smov 0   ;;  %s1290_s13 = smov 0   ;;  %s1508_s0 = inlined_call_operand.vmem [shape: bf16[512,147], index: 0, kind: input, shape index: {}]   ;;  %s1509_s1 = inlined_call_operand.vmem [shape: bf16[147,64], index: 1, kind: input, shape index: {}]   ;;  %s1510_s2 = inlined_call_operand.vmem [shape: f32[1,64], index: 2, kind: input, shape index: {}]   ;;  %s1511_s3 = inlined_call_operand.vmem [shape: bf16[512,64], index: 3, kind: output, shape index: {}]  }
   0x1   :  { %s1292_s14 = smov 0  }
   0x2 LB: > { %s25_s15 = sadd.s32 1, %s1260_s13  ;;  %p1006_p0 = scmp.ge.s32.totalorder %s1264_s14, 1  ;;  %s1264_s14 = sphi %s1292_s14, %s13_s14   ;;  %s1260_s13 = sphi %s1290_s13, %s1513_s13   ;;  %s1256_s12 = sphi %s1288_s12, %s1512_s12  }
   0x3   : > { %p27_p1 = scmp.ge.s32.totalorder %s25_s15, 2  ;;  %p170_p2 = scmp.lt.s32.totalorder %s1264_s14, 3 }
   0x5   : > { %s1515_s15 = smov (%p27_p1, %s25_s15), 0  ;;  %p171_p3 = pnand %p1006_p0, %p170_p2 }
   0x6   : > { %v1184_v0 = vld [vmem:[%s1509_s1] sm:$0xff] (!%p171_p3)   ;;  %v1266_v1 = vmov (!%p171_p3), 0   ;;  %v1185_v2 = vld [vmem:[%s1509_s1 + $0x8] sm:$0xff] (!%p171_p3)   ;;  %v1186_v3 = vld [vmem:[%s1509_s1 + $0x10] sm:$0xff] (!%p171_p3)   ;;  %s1007_s22 = sshll.u32 (!%p171_p3), %s1256_s12, 5  ;;  %vm488_vm0 = vcmask (!%p171_p3), 154624  }
   0x7   : > { %174 = sbr.rel (%p171_p3) target bundleno = 324 (0x144), region = 32  ;;  %544 = vmatprep.subr.bf16.mxu0 (!%p171_p3), %v1266_v1  ;;  %1138 = vmatprep.subr.bf16.mxu1 (!%p171_p3), %v1266_v1  ;;  %p206_p4 = scmp.lt.s32.totalorder (!%p171_p3), %s1007_s22, 63  ;;  %v1187_v4 = vld [vmem:[%s1509_s1 + $0x18] sm:$0xff] (!%p171_p3)   ;;  %v1188_v5 = vld [vmem:[%s1509_s1 + $0x20] sm:$0xff] (!%p171_p3)   ;;  %v1189_v8 = vld [vmem:[%s1509_s1 + $0x28] sm:$0xff] (!%p171_p3)   ;;  %vm537_vm1 = vcmask (!%p171_p3), 1040384  }
   0x8   : > { %545 = vmatpush1.bf16.msra.mxu0 (!%p171_p3), %v1184_v0  ;;  %1148 = vmatpush1.bf16.msra.mxu1 (!%p171_p3), %v1184_v0  ;;  %v1190_v9 = vld [vmem:[%s1509_s1 + $0x30] sm:$0xff] (!%p171_p3)   ;;  %v1191_v10 = vld [vmem:[%s1509_s1 + $0x38] sm:$0xff] (!%p171_p3)   ;;  %vm538_vm2 = vcmask (!%p171_p3), 1041408   ;;  %v1267_v11 = vmov (!%p171_p3), 65535   ;;  %v1192_v13 = vld [vmem:[%s1509_s1 + $0x40] sm:$0xff] (!%p171_p3)   ;;  %vm865_vm3 = vcmask (!%p171_p3), 519168  }
   0x9   : > { %546 = vmatprep.subr.bf16.mxu0 (!%p171_p3), %v1266_v1  ;;  %1139 = vmatprep.subr.bf16.mxu1 (!%p171_p3), %v1266_v1  ;;  %v539_v12 = vsel (!%p171_p3), %vm537_vm1, 4294967295, %v1267_v11  ;;  %v1193_v14 = vld [vmem:[%s1509_s1 + $0x48] ss:$0 sps:$4 sm:$0x33] (!%p171_p3)   ;;  %v1395_v47 = vld [vmem:[%s1510_s2] ss:$0 sm:$0xff] (!%p171_p3) }
   0xa   : > { %v540_v15 = vsel (!%p171_p3), %vm538_vm2, %v539_v12, 0 }
   0xb   : > { %v542_v16 = vand.u32 (!%p171_p3), %v1193_v14, %v540_v15 }
   0xc   : > { %547 = vmatpush1.bf16.msra.mxu0 (!%p171_p3), %v1185_v2  ;;  %1149 = vmatpush1.bf16.msra.mxu1 (!%p171_p3), %v1185_v2 }
   0xd   : > { %548 = vmatprep.subr.bf16.mxu0 (!%p171_p3), %v1266_v1  ;;  %1140 = vmatprep.subr.bf16.mxu1 (!%p171_p3), %v1266_v1 }
   0xe   : > { %s1517_s22 = smov (!%p206_p4, %s1007_s22), 63 }
   0xf   : > { %s1105_s25 = sshll.u32 %s1517_s22, 3  ;;  %s1011_s19 = sshll.u32 %s1517_s22, 2 }
  0x10   : > { %549 = vmatpush1.bf16.msra.mxu0 %v1186_v3  ;;  %1150 = vmatpush1.bf16.msra.mxu1 %v1186_v3  ;;  %s1324_s28 = scalar_lea.vmem %s1508_s0, %s1105_s25  ;;  %s1405_s22 = scalar_lea.vmem %s1511_s3, %s1011_s19 }
  0x11   : > { %550 = vmatprep.subr.bf16.mxu0 %v1266_v1  ;;  %1141 = vmatprep.subr.bf16.mxu1 %v1266_v1  ;;  %v1196_v6 = vld [vmem:[%s1324_s28 + $0x4] ss:$8 sps:$4 sm:$0xff]   ;;  %v1194_v17 = vld [vmem:[%s1324_s28] ss:$8 sps:$4 sm:$0xff]   ;;  %v1200_v19 = vld [vmem:[%s1324_s28 + $0x14] ss:$8 sps:$4 sm:$0xff]  }
  0x12   : > { %v1199_v7 = vld [vmem:[%s1324_s28 + $0x84] ss:$8 sps:$4 sm:$0xff]   ;;  %1055 = vmatprep.mubr.msk.bf16.mxu0 %vm488_vm0, %v1196_v6  ;;  %v1197_v18 = vld [vmem:[%s1324_s28 + $0x80] ss:$8 sps:$4 sm:$0xff]   ;;  %v1202_v20 = vld [vmem:[%s1324_s28 + $0x94] ss:$8 sps:$4 sm:$0xff]  }
  0x13   : > { %1063 = vmatprep.mubr.msk.bf16.mxu1 %vm488_vm0, %v1199_v7  ;;  %v1204_v21 = vld [vmem:[%s1324_s28 + $0x10] ss:$8 sps:$4 sm:$0xff]   ;;  %v1206_v23 = vld [vmem:[%s1324_s28 + $0x24] ss:$8 sps:$4 sm:$0xff]   ;;  %v1210_v25 = vld [vmem:[%s1324_s28 + $0x20] ss:$8 sps:$4 sm:$0xff]  }
  0x14   : > { %551 = vmatpush1.bf16.msra.mxu0 %v1187_v4  ;;  %1151 = vmatpush1.bf16.msra.mxu1 %v1187_v4  ;;  %v1205_v22 = vld [vmem:[%s1324_s28 + $0x90] ss:$8 sps:$4 sm:$0xff]   ;;  %v1208_v24 = vld [vmem:[%s1324_s28 + $0xa4] ss:$8 sps:$4 sm:$0xff]   ;;  %v1211_v26 = vld [vmem:[%s1324_s28 + $0xa0] ss:$8 sps:$4 sm:$0xff]  }
  0x15   : > { %552 = vmatprep.subr.bf16.mxu0 %v1266_v1  ;;  %1142 = vmatprep.subr.bf16.mxu1 %v1266_v1  ;;  %v1212_v27 = vld [vmem:[%s1324_s28 + $0x34] ss:$8 sps:$4 sm:$0xff]   ;;  %v1216_v29 = vld [vmem:[%s1324_s28 + $0x30] ss:$8 sps:$4 sm:$0xff]   ;;  %v1218_v31 = vld [vmem:[%s1324_s28 + $0x44] ss:$8 sps:$4 sm:$0xff]  }
  0x16   : > { %v1214_v28 = vld [vmem:[%s1324_s28 + $0xb4] ss:$8 sps:$4 sm:$0xff]   ;;  %v1217_v30 = vld [vmem:[%s1324_s28 + $0xb0] ss:$8 sps:$4 sm:$0xff]   ;;  %v1220_v32 = vld [vmem:[%s1324_s28 + $0xc4] ss:$8 sps:$4 sm:$0xff]  }
  0x17   : > { %v1222_v33 = vld [vmem:[%s1324_s28 + $0x40] ss:$8 sps:$4 sm:$0xff]   ;;  %v1224_v35 = vld [vmem:[%s1324_s28 + $0x54] ss:$8 sps:$4 sm:$0xff]   ;;  %v1228_v37 = vld [vmem:[%s1324_s28 + $0x50] ss:$8 sps:$4 sm:$0xff]  }
  0x18   : > { %553 = vmatpush1.bf16.msra.mxu0 %v1188_v5  ;;  %1152 = vmatpush1.bf16.msra.mxu1 %v1188_v5  ;;  %v1223_v34 = vld [vmem:[%s1324_s28 + $0xc0] ss:$8 sps:$4 sm:$0xff]   ;;  %v1226_v36 = vld [vmem:[%s1324_s28 + $0xd4] ss:$8 sps:$4 sm:$0xff]   ;;  %v1229_v38 = vld [vmem:[%s1324_s28 + $0xd0] ss:$8 sps:$4 sm:$0xff]  }
  0x19   : > { %554 = vmatprep.subr.bf16.mxu0 %v1266_v1  ;;  %1143 = vmatprep.subr.bf16.mxu1 %v1266_v1  ;;  %v1230_v39 = vld [vmem:[%s1324_s28 + $0x64] ss:$8 sps:$4 sm:$0xff]   ;;  %v1234_v41 = vld [vmem:[%s1324_s28 + $0x60] ss:$8 sps:$4 sm:$0xff]   ;;  %v1236_v43 = vld [vmem:[%s1324_s28 + $0x74] ss:$8 sps:$4 sm:$0xff]  }
  0x1a   : > { %v1232_v40 = vld [vmem:[%s1324_s28 + $0xe4] ss:$8 sps:$4 sm:$0xff]   ;;  %v1235_v42 = vld [vmem:[%s1324_s28 + $0xe0] ss:$8 sps:$4 sm:$0xff]   ;;  %v1238_v44 = vld [vmem:[%s1324_s28 + $0xf4] ss:$8 sps:$4 sm:$0xff]  }
  0x1b   : > { %v1240_v45 = vld [vmem:[%s1324_s28 + $0x70] ss:$8 sps:$4 sm:$0xff]  }
  0x1c   : > { %555 = vmatpush1.bf16.msra.mxu0 %v1189_v8  ;;  %1153 = vmatpush1.bf16.msra.mxu1 %v1189_v8  ;;  %v1241_v46 = vld [vmem:[%s1324_s28 + $0xf0] ss:$8 sps:$4 sm:$0xff]  }
  0x1d   : > { %556 = vmatprep.subr.bf16.mxu0 %v1266_v1  ;;  %1144 = vmatprep.subr.bf16.mxu1 %v1266_v1 }
  0x20   : > { %557 = vmatpush1.bf16.msra.mxu0 %v1190_v9  ;;  %1154 = vmatpush1.bf16.msra.mxu1 %v1190_v9 }
  0x21   : > { %558 = vmatprep.subr.bf16.mxu0 %v1266_v1  ;;  %1145 = vmatprep.subr.bf16.mxu1 %v1266_v1 }
  0x24   : > { %559 = vmatpush1.bf16.msra.mxu0 %v1191_v10  ;;  %1155 = vmatpush1.bf16.msra.mxu1 %v1191_v10 }
  0x25   : > { %560 = vmatprep.subr.bf16.mxu0 %v1266_v1  ;;  %1146 = vmatprep.subr.bf16.mxu1 %v1266_v1 }
  0x28   : > { %561 = vmatpush1.bf16.msra.mxu0 %v1192_v13  ;;  %1156 = vmatpush1.bf16.msra.mxu1 %v1192_v13 }
  0x29   : > { %562 = vmatprep.subr.bf16.mxu0 %v1266_v1  ;;  %1147 = vmatprep.subr.bf16.mxu1 %v1266_v1 }
  0x2c   : > { %563 = vmatpush1.bf16.msra.mxu0 %v542_v16  ;;  %1157 = vmatpush1.bf16.msra.mxu1 %v542_v16 }
  0x2f   : > { %577 = vmatmul.mubr.bf16.vlgmr.msra.gmra.mrb[0].mxu0 %v1194_v17  ;;  %641 = vmatmul.mubr.bf16.vlgmr.msra.gmra.mrb[0].mxu1 %v1197_v18 }
  0x30   : > { %1056 = vmatprep.mubr.msk.bf16.mxu0 %vm488_vm0, %v1200_v19  ;;  %1064 = vmatprep.mubr.msk.bf16.mxu1 %vm488_vm0, %v1202_v20 }
  0x37   : > { %585 = vmatmul.mubr.bf16.gmra.mrb[4].mxu0 %v1204_v21  ;;  %649 = vmatmul.mubr.bf16.gmra.mrb[4].mxu1 %v1205_v22 }
  0x38   : > { %1057 = vmatprep.mubr.msk.bf16.mxu0 %vm488_vm0, %v1206_v23  ;;  %1065 = vmatprep.mubr.msk.bf16.mxu1 %vm488_vm0, %v1208_v24 }
  0x3f   : > { %593 = vmatmul.mubr.bf16.gmra.mrb[8].mxu0 %v1210_v25  ;;  %657 = vmatmul.mubr.bf16.gmra.mrb[8].mxu1 %v1211_v26 }
  0x40   : > { %1058 = vmatprep.mubr.msk.bf16.mxu0 %vm488_vm0, %v1212_v27  ;;  %1066 = vmatprep.mubr.msk.bf16.mxu1 %vm488_vm0, %v1214_v28 }
  0x47   : > { %601 = vmatmul.mubr.bf16.gmra.mrb[12].mxu0 %v1216_v29  ;;  %665 = vmatmul.mubr.bf16.gmra.mrb[12].mxu1 %v1217_v30 }
  0x48   : > { %1059 = vmatprep.mubr.msk.bf16.mxu0 %vm488_vm0, %v1218_v31  ;;  %1067 = vmatprep.mubr.msk.bf16.mxu1 %vm488_vm0, %v1220_v32 }
  0x4f   : > { %609 = vmatmul.mubr.bf16.gmra.mrb[16].mxu0 %v1222_v33  ;;  %673 = vmatmul.mubr.bf16.gmra.mrb[16].mxu1 %v1223_v34 }
  0x50   : > { %1060 = vmatprep.mubr.msk.bf16.mxu0 %vm488_vm0, %v1224_v35  ;;  %1068 = vmatprep.mubr.msk.bf16.mxu1 %vm488_vm0, %v1226_v36 }
  0x57   : > { %617 = vmatmul.mubr.bf16.gmra.mrb[20].mxu0 %v1228_v37  ;;  %681 = vmatmul.mubr.bf16.gmra.mrb[20].mxu1 %v1229_v38 }
  0x58   : > { %1061 = vmatprep.mubr.msk.bf16.mxu0 %vm488_vm0, %v1230_v39  ;;  %1069 = vmatprep.mubr.msk.bf16.mxu1 %vm488_vm0, %v1232_v40 }
  0x5f   : > { %625 = vmatmul.mubr.bf16.gmra.mrb[24].mxu0 %v1234_v41  ;;  %689 = vmatmul.mubr.bf16.gmra.mrb[24].mxu1 %v1235_v42 }
  0x60   : > { %1062 = vmatprep.mubr.msk.bf16.mxu0 %vm488_vm0, %v1236_v43  ;;  %1070 = vmatprep.mubr.msk.bf16.mxu1 %vm488_vm0, %v1238_v44 }
  0x67   : > { %633 = vmatmul.mubr.bf16.gmra.mrb[28].mxu0 %v1240_v45  ;;  %697 = vmatmul.mubr.bf16.gmra.mrb[28].mxu1 %v1241_v46 }
 0x102   : > { %v578_v48 = vpop.f32.mrb[0].mxu0  ;;  %v642_v49 = vpop.f32.mrb[0].mxu1 }
 0x103   : > { %v579_v50 = vadd.f32 %v1395_v47, %v578_v48  ;;  %v643_v51 = vadd.f32 %v1395_v47, %v642_v49  ;;  %v580_v52 = vpop.f32.mrb[1].mxu0  ;;  %v644_v53 = vpop.f32.mrb[1].mxu1 }
 0x104   : > { %v581_v54 = vpop.f32.mrb[2].mxu0  ;;  %v645_v55 = vpop.f32.mrb[2].mxu1 }
 0x105   : > { %v705_v56 = vmax.f32 %v579_v50, 0.0  ;;  %v721_v57 = vmax.f32 %v643_v51, 0.0  ;;  %v582_v58 = vadd.f32 %v1395_v47, %v581_v54  ;;  %v646_v59 = vadd.f32 %v1395_v47, %v645_v55  ;;  %v583_v60 = vpop.f32.mrb[3].mxu0  ;;  %v647_v61 = vpop.f32.mrb[3].mxu1 }
 0x107   : > { %v1106_v62 = vpack.c.bf16 %v705_v56, %v705_v56  ;;  %v1122_v63 = vpack.c.bf16 %v721_v57, %v721_v57  ;;  %v706_v0 = vmax.f32 %v582_v58, 0.0  ;;  %v722_v1 = vmax.f32 %v646_v59, 0.0 }
 0x109   : > { %866 = vst.msk [vmem:[%s1405_s22] sm:$0xf] %vm865_vm3, %v1106_v62  ;;  %882 = vst.msk [vmem:[%s1405_s22 + $0x40] sm:$0xf] %vm865_vm3, %v1122_v63  ;;  %v1107_v2 = vpack.c.bf16 %v706_v0, %v706_v0  ;;  %v1123_v3 = vpack.c.bf16 %v722_v1, %v722_v1 }
 0x10a   : > { %v586_v4 = vpop.f32.mrb[4].mxu0  ;;  %v650_v5 = vpop.f32.mrb[4].mxu1 }
 0x10b   : > { %867 = vst.msk [vmem:[%s1405_s22 + $0x4] sm:$0xf] %vm865_vm3, %v1107_v2  ;;  %883 = vst.msk [vmem:[%s1405_s22 + $0x44] sm:$0xf] %vm865_vm3, %v1123_v3  ;;  %v587_v6 = vadd.f32 %v1395_v47, %v586_v4  ;;  %v651_v7 = vadd.f32 %v1395_v47, %v650_v5  ;;  %v588_v8 = vpop.f32.mrb[5].mxu0  ;;  %v652_v9 = vpop.f32.mrb[5].mxu1 }
 0x10c   : > { %v589_v10 = vpop.f32.mrb[6].mxu0  ;;  %v653_v11 = vpop.f32.mrb[6].mxu1 }
 0x10d   : > { %v707_v12 = vmax.f32 %v587_v6, 0.0  ;;  %v723_v13 = vmax.f32 %v651_v7, 0.0  ;;  %v590_v14 = vadd.f32 %v1395_v47, %v589_v10  ;;  %v654_v15 = vadd.f32 %v1395_v47, %v653_v11  ;;  %v591_v16 = vpop.f32.mrb[7].mxu0  ;;  %v655_v17 = vpop.f32.mrb[7].mxu1 }
 0x10f   : > { %v1108_v18 = vpack.c.bf16 %v707_v12, %v707_v12  ;;  %v1124_v19 = vpack.c.bf16 %v723_v13, %v723_v13  ;;  %v708_v20 = vmax.f32 %v590_v14, 0.0  ;;  %v724_v21 = vmax.f32 %v654_v15, 0.0 }
 0x111   : > { %868 = vst.msk [vmem:[%s1405_s22 + $0x8] sm:$0xf] %vm865_vm3, %v1108_v18  ;;  %884 = vst.msk [vmem:[%s1405_s22 + $0x48] sm:$0xf] %vm865_vm3, %v1124_v19  ;;  %v1109_v22 = vpack.c.bf16 %v708_v20, %v708_v20  ;;  %v1125_v23 = vpack.c.bf16 %v724_v21, %v724_v21 }
 0x112   : > { %v594_v24 = vpop.f32.mrb[8].mxu0  ;;  %v658_v25 = vpop.f32.mrb[8].mxu1 }
 0x113   : > { %869 = vst.msk [vmem:[%s1405_s22 + $0xc] sm:$0xf] %vm865_vm3, %v1109_v22  ;;  %885 = vst.msk [vmem:[%s1405_s22 + $0x4c] sm:$0xf] %vm865_vm3, %v1125_v23  ;;  %v595_v26 = vadd.f32 %v1395_v47, %v594_v24  ;;  %v659_v27 = vadd.f32 %v1395_v47, %v658_v25  ;;  %v596_v28 = vpop.f32.mrb[9].mxu0  ;;  %v660_v29 = vpop.f32.mrb[9].mxu1 }
 0x114   : > { %v597_v30 = vpop.f32.mrb[10].mxu0  ;;  %v661_v31 = vpop.f32.mrb[10].mxu1 }
 0x115   : > { %v709_v32 = vmax.f32 %v595_v26, 0.0  ;;  %v725_v33 = vmax.f32 %v659_v27, 0.0  ;;  %v598_v34 = vadd.f32 %v1395_v47, %v597_v30  ;;  %v662_v35 = vadd.f32 %v1395_v47, %v661_v31  ;;  %v599_v36 = vpop.f32.mrb[11].mxu0  ;;  %v663_v37 = vpop.f32.mrb[11].mxu1 }
 0x117   : > { %v1110_v38 = vpack.c.bf16 %v709_v32, %v709_v32  ;;  %v1126_v39 = vpack.c.bf16 %v725_v33, %v725_v33  ;;  %v710_v40 = vmax.f32 %v598_v34, 0.0  ;;  %v726_v41 = vmax.f32 %v662_v35, 0.0 }
 0x119   : > { %870 = vst.msk [vmem:[%s1405_s22 + $0x10] sm:$0xf] %vm865_vm3, %v1110_v38  ;;  %886 = vst.msk [vmem:[%s1405_s22 + $0x50] sm:$0xf] %vm865_vm3, %v1126_v39  ;;  %v1111_v42 = vpack.c.bf16 %v710_v40, %v710_v40  ;;  %v1127_v43 = vpack.c.bf16 %v726_v41, %v726_v41 }
 0x11a   : > { %v602_v44 = vpop.f32.mrb[12].mxu0  ;;  %v666_v45 = vpop.f32.mrb[12].mxu1 }
 0x11b   : > { %871 = vst.msk [vmem:[%s1405_s22 + $0x14] sm:$0xf] %vm865_vm3, %v1111_v42  ;;  %887 = vst.msk [vmem:[%s1405_s22 + $0x54] sm:$0xf] %vm865_vm3, %v1127_v43  ;;  %v603_v46 = vadd.f32 %v1395_v47, %v602_v44  ;;  %v667_v48 = vadd.f32 %v1395_v47, %v666_v45  ;;  %v604_v49 = vpop.f32.mrb[13].mxu0  ;;  %v668_v50 = vpop.f32.mrb[13].mxu1 }
 0x11c   : > { %v605_v51 = vpop.f32.mrb[14].mxu0  ;;  %v669_v52 = vpop.f32.mrb[14].mxu1 }
 0x11d   : > { %v711_v53 = vmax.f32 %v603_v46, 0.0  ;;  %v727_v54 = vmax.f32 %v667_v48, 0.0  ;;  %v606_v55 = vadd.f32 %v1395_v47, %v605_v51  ;;  %v670_v56 = vadd.f32 %v1395_v47, %v669_v52  ;;  %v607_v57 = vpop.f32.mrb[15].mxu0  ;;  %v671_v58 = vpop.f32.mrb[15].mxu1 }
 0x11f   : > { %v1112_v59 = vpack.c.bf16 %v711_v53, %v711_v53  ;;  %v1128_v60 = vpack.c.bf16 %v727_v54, %v727_v54  ;;  %v712_v61 = vmax.f32 %v606_v55, 0.0  ;;  %v728_v62 = vmax.f32 %v670_v56, 0.0 }
 0x121   : > { %872 = vst.msk [vmem:[%s1405_s22 + $0x18] sm:$0xf] %vm865_vm3, %v1112_v59  ;;  %888 = vst.msk [vmem:[%s1405_s22 + $0x58] sm:$0xf] %vm865_vm3, %v1128_v60  ;;  %v1113_v63 = vpack.c.bf16 %v712_v61, %v712_v61  ;;  %v1129_v0 = vpack.c.bf16 %v728_v62, %v728_v62 }
 0x122   : > { %v610_v1 = vpop.f32.mrb[16].mxu0  ;;  %v674_v2 = vpop.f32.mrb[16].mxu1 }
 0x123   : > { %873 = vst.msk [vmem:[%s1405_s22 + $0x1c] sm:$0xf] %vm865_vm3, %v1113_v63  ;;  %889 = vst.msk [vmem:[%s1405_s22 + $0x5c] sm:$0xf] %vm865_vm3, %v1129_v0  ;;  %v611_v3 = vadd.f32 %v1395_v47, %v610_v1  ;;  %v675_v4 = vadd.f32 %v1395_v47, %v674_v2  ;;  %v612_v5 = vpop.f32.mrb[17].mxu0  ;;  %v676_v6 = vpop.f32.mrb[17].mxu1 }
 0x124   : > { %v613_v7 = vpop.f32.mrb[18].mxu0  ;;  %v677_v8 = vpop.f32.mrb[18].mxu1 }
 0x125   : > { %v713_v9 = vmax.f32 %v611_v3, 0.0  ;;  %v729_v10 = vmax.f32 %v675_v4, 0.0  ;;  %v614_v11 = vadd.f32 %v1395_v47, %v613_v7  ;;  %v678_v12 = vadd.f32 %v1395_v47, %v677_v8  ;;  %v615_v13 = vpop.f32.mrb[19].mxu0  ;;  %v679_v14 = vpop.f32.mrb[19].mxu1 }
 0x127   : > { %v1114_v15 = vpack.c.bf16 %v713_v9, %v713_v9  ;;  %v1130_v16 = vpack.c.bf16 %v729_v10, %v729_v10  ;;  %v714_v17 = vmax.f32 %v614_v11, 0.0  ;;  %v730_v18 = vmax.f32 %v678_v12, 0.0 }
 0x129   : > { %874 = vst.msk [vmem:[%s1405_s22 + $0x20] sm:$0xf] %vm865_vm3, %v1114_v15  ;;  %890 = vst.msk [vmem:[%s1405_s22 + $0x60] sm:$0xf] %vm865_vm3, %v1130_v16  ;;  %v1115_v19 = vpack.c.bf16 %v714_v17, %v714_v17  ;;  %v1131_v20 = vpack.c.bf16 %v730_v18, %v730_v18 }
 0x12a   : > { %v618_v21 = vpop.f32.mrb[20].mxu0  ;;  %v682_v22 = vpop.f32.mrb[20].mxu1 }
 0x12b   : > { %875 = vst.msk [vmem:[%s1405_s22 + $0x24] sm:$0xf] %vm865_vm3, %v1115_v19  ;;  %891 = vst.msk [vmem:[%s1405_s22 + $0x64] sm:$0xf] %vm865_vm3, %v1131_v20  ;;  %v619_v23 = vadd.f32 %v1395_v47, %v618_v21  ;;  %v683_v24 = vadd.f32 %v1395_v47, %v682_v22  ;;  %v620_v25 = vpop.f32.mrb[21].mxu0  ;;  %v684_v26 = vpop.f32.mrb[21].mxu1 }
 0x12c   : > { %v621_v27 = vpop.f32.mrb[22].mxu0  ;;  %v685_v28 = vpop.f32.mrb[22].mxu1 }
 0x12d   : > { %v715_v29 = vmax.f32 %v619_v23, 0.0  ;;  %v731_v30 = vmax.f32 %v683_v24, 0.0  ;;  %v622_v31 = vadd.f32 %v1395_v47, %v621_v27  ;;  %v686_v32 = vadd.f32 %v1395_v47, %v685_v28  ;;  %v623_v33 = vpop.f32.mrb[23].mxu0  ;;  %v687_v34 = vpop.f32.mrb[23].mxu1 }
 0x12f   : > { %v1116_v35 = vpack.c.bf16 %v715_v29, %v715_v29  ;;  %v1132_v36 = vpack.c.bf16 %v731_v30, %v731_v30  ;;  %v716_v37 = vmax.f32 %v622_v31, 0.0  ;;  %v732_v38 = vmax.f32 %v686_v32, 0.0 }
 0x131   : > { %876 = vst.msk [vmem:[%s1405_s22 + $0x28] sm:$0xf] %vm865_vm3, %v1116_v35  ;;  %892 = vst.msk [vmem:[%s1405_s22 + $0x68] sm:$0xf] %vm865_vm3, %v1132_v36  ;;  %v1117_v39 = vpack.c.bf16 %v716_v37, %v716_v37  ;;  %v1133_v40 = vpack.c.bf16 %v732_v38, %v732_v38 }
 0x132   : > { %v626_v41 = vpop.f32.mrb[24].mxu0  ;;  %v690_v42 = vpop.f32.mrb[24].mxu1 }
 0x133   : > { %877 = vst.msk [vmem:[%s1405_s22 + $0x2c] sm:$0xf] %vm865_vm3, %v1117_v39  ;;  %893 = vst.msk [vmem:[%s1405_s22 + $0x6c] sm:$0xf] %vm865_vm3, %v1133_v40  ;;  %v627_v43 = vadd.f32 %v1395_v47, %v626_v41  ;;  %v691_v44 = vadd.f32 %v1395_v47, %v690_v42  ;;  %v628_v45 = vpop.f32.mrb[25].mxu0  ;;  %v692_v46 = vpop.f32.mrb[25].mxu1 }
 0x134   : > { %v629_v48 = vpop.f32.mrb[26].mxu0  ;;  %v693_v49 = vpop.f32.mrb[26].mxu1 }
 0x135   : > { %v717_v50 = vmax.f32 %v627_v43, 0.0  ;;  %v733_v51 = vmax.f32 %v691_v44, 0.0  ;;  %v630_v52 = vadd.f32 %v1395_v47, %v629_v48  ;;  %v694_v53 = vadd.f32 %v1395_v47, %v693_v49  ;;  %v631_v54 = vpop.f32.mrb[27].mxu0  ;;  %v695_v55 = vpop.f32.mrb[27].mxu1 }
 0x137   : > { %v1118_v56 = vpack.c.bf16 %v717_v50, %v717_v50  ;;  %v1134_v57 = vpack.c.bf16 %v733_v51, %v733_v51  ;;  %v718_v58 = vmax.f32 %v630_v52, 0.0  ;;  %v734_v59 = vmax.f32 %v694_v53, 0.0 }
 0x139   : > { %878 = vst.msk [vmem:[%s1405_s22 + $0x30] sm:$0xf] %vm865_vm3, %v1118_v56  ;;  %894 = vst.msk [vmem:[%s1405_s22 + $0x70] sm:$0xf] %vm865_vm3, %v1134_v57  ;;  %v1119_v60 = vpack.c.bf16 %v718_v58, %v718_v58  ;;  %v1135_v61 = vpack.c.bf16 %v734_v59, %v734_v59 }
 0x13a   : > { %v634_v62 = vpop.f32.mrb[28].mxu0  ;;  %v698_v63 = vpop.f32.mrb[28].mxu1 }
 0x13b   : > { %879 = vst.msk [vmem:[%s1405_s22 + $0x34] sm:$0xf] %vm865_vm3, %v1119_v60  ;;  %895 = vst.msk [vmem:[%s1405_s22 + $0x74] sm:$0xf] %vm865_vm3, %v1135_v61  ;;  %v635_v0 = vadd.f32 %v1395_v47, %v634_v62  ;;  %v699_v1 = vadd.f32 %v1395_v47, %v698_v63  ;;  %v636_v2 = vpop.f32.mrb[29].mxu0  ;;  %v700_v3 = vpop.f32.mrb[29].mxu1 }
 0x13c   : > { %v637_v4 = vpop.f32.mrb[30].mxu0  ;;  %v701_v5 = vpop.f32.mrb[30].mxu1 }
 0x13d   : > { %v719_v6 = vmax.f32 %v635_v0, 0.0  ;;  %v735_v7 = vmax.f32 %v699_v1, 0.0  ;;  %v638_v8 = vadd.f32 %v1395_v47, %v637_v4  ;;  %v702_v9 = vadd.f32 %v1395_v47, %v701_v5  ;;  %v639_v10 = vpop.f32.mrb[31].mxu0  ;;  %v703_v11 = vpop.f32.mrb[31].mxu1 }
 0x13f   : > { %v1120_v12 = vpack.c.bf16 %v719_v6, %v719_v6  ;;  %v1136_v13 = vpack.c.bf16 %v735_v7, %v735_v7  ;;  %v720_v14 = vmax.f32 %v638_v8, 0.0  ;;  %v736_v15 = vmax.f32 %v702_v9, 0.0 }
 0x141   : > { %880 = vst.msk [vmem:[%s1405_s22 + $0x38] sm:$0xf] %vm865_vm3, %v1120_v12  ;;  %896 = vst.msk [vmem:[%s1405_s22 + $0x78] sm:$0xf] %vm865_vm3, %v1136_v13  ;;  %v1121_v16 = vpack.c.bf16 %v720_v14, %v720_v14  ;;  %v1137_v17 = vpack.c.bf16 %v736_v15, %v736_v15 }
 0x143   : > { %881 = vst.msk [vmem:[%s1405_s22 + $0x3c] sm:$0xf] %vm865_vm3, %v1121_v16  ;;  %897 = vst.msk [vmem:[%s1405_s22 + $0x7c] sm:$0xf] %vm865_vm3, %v1137_v17 }
 0x144 PF: > { %s13_s14 = sadd.s32 1, %s1264_s14   ;;  %s1512_s12 = smov %s1260_s13 }
 0x145   : > { %p10_p5 = scmp.ge.s32.totalorder %s13_s14, 4   ;;  %s1513_s13 = smov %s1515_s15 }
 0x147   :  { %12 = sbr.rel (!%p10_p5) target bundleno = 2 (0x2), region = 68 }

</bundles_post_ra>
